<compile_context>
chip_gen: v6e
topology: v6e:2x2x1
jax: 0.10.0
libtpu: 0.0.40
codegen_flags: <defaults>
</compile_context>

<pallas_src>
import math
import numpy as np
import jax
import jax.numpy as jnp
from jax import lax
from jax.experimental import pallas as pl
from jax.experimental.pallas import tpu as pltpu

# ----- scaled-down YosoConfig (defaults: use_expectation=True, conv_window=None) -----
NUM_HEADS = 2
HASH_CODE_LEN = 9
LN_EPS = 1e-12


def _vmem_limit_bytes():
    # v7x: 64 MiB / TensorCore -> ~48 MiB limit; v5e/v6e: 128 MiB -> ~96-100 MiB.
    try:
        cap = pltpu.get_tpu_info().vmem_capacity_bytes
    except Exception:
        cap = 128 * 1024 * 1024
    return max(32 * 1024 * 1024, min(int(cap) * 3 // 4, 100 * 1024 * 1024))


# ----------------------------- in-kernel math helpers -----------------------------
# arccos via Abramowitz & Stegun 4.4.46 (|err| <= 2e-8), with 1/pi folded into the
# coefficients so we directly get acos(x)/pi from sqrt/mul/add only.
_ACOS_OVER_PI_COEFFS = tuple(
    c / math.pi for c in (-0.0012624911, 0.0066700901, -0.0170881256, 0.0308918810,
                          -0.0501743046, 0.0889789874, -0.2145988016, 1.5707963050))


def _expectation_base(x):
    """Returns 1 - arccos(x)/pi. Domain-safe for |x| slightly > 1 (fp32 roundoff)."""
    ax = jnp.abs(x)
    p = _ACOS_OVER_PI_COEFFS[0]
    for c in _ACOS_OVER_PI_COEFFS[1:]:
        p = p * ax + c
    s = jnp.sqrt(jnp.maximum(1.0 - ax, 0.0)) * p          # = arccos(|x|)/pi
    return jnp.where(x < 0.0, s, 1.0 - s)


def _erf(x):
    # erf via Abramowitz & Stegun 7.1.26 (|err| <= 1.5e-7); exp is EUP-supported.
    a1, a2, a3, a4, a5 = (0.254829592, -0.284496736, 1.421413741,
                          -1.453152027, 1.061405429)
    pp = 0.3275911
    ax = jnp.abs(x)
    t = 1.0 / (1.0 + pp * ax)
    poly = ((((a5 * t + a4) * t + a3) * t + a2) * t + a1) * t
    y = 1.0 - poly * jnp.exp(-ax * ax)
    return jnp.where(x < 0.0, -y, y)


def _gelu(x):
    # exact (erf-based) GELU, matching transformers ACT2FN["gelu"]
    return 0.5 * x * (1.0 + _erf(x * (1.0 / math.sqrt(2.0))))


def _l2norm(x):
    # torch nn.functional.normalize(p=2, dim=-1, eps=1e-12), rsqrt formulation (EUP)
    ss = jnp.sum(x * x, axis=-1, keepdims=True)
    return x * lax.rsqrt(jnp.maximum(ss, 1e-24))


def _layer_norm(x, gamma, beta):
    mu = jnp.mean(x, axis=-1, keepdims=True)
    xc = x - mu
    var = jnp.mean(xc * xc, axis=-1, keepdims=True)
    return xc * lax.rsqrt(var + LN_EPS) * gamma + beta


def _ipow(x, n):
    # static-integer power by repeated squaring
    r = None
    b = x
    while n > 0:
        if n & 1:
            r = b if r is None else r * b
        n >>= 1
        if n:
            b = b * b
    return r


# ----------------------------------- kernels ---------------------------------------
def yoso_qkv_kernel(x_ref, km_ref,
                    wq_ref, bq_ref, wk_ref, bk_ref, wv_ref, bv_ref, bd_ref,
                    qn_ref, kn_ref, vm_ref):
    x = x_ref[...]                          # (ts, D) f32
    km = km_ref[...]                        # (ts, 1) key mask (0/1)
    q = jnp.dot(x, wq_ref[...], preferred_element_type=jnp.float32) + bq_ref[...]
    k = jnp.dot(x, wk_ref[...], preferred_element_type=jnp.float32) + bk_ref[...]
    # fold the key mask into V: replaces the (S,S) mask on the expectation matrix
    v = (jnp.dot(x, wv_ref[...], preferred_element_type=jnp.float32) + bv_ref[...]) * km

    # per-head sum-of-squares via block-diagonal-ones matmul: full-width elementwise,
    # no lane-sliced segment reductions; single rsqrt (EUP) multiply.
    bd = bd_ref[...]                        # (D, D) block-diag ones
    qn = q * lax.rsqrt(jnp.maximum(
        jnp.dot(q * q, bd, preferred_element_type=jnp.float32), 1e-24))
    kn = k * lax.rsqrt(jnp.maximum(
        jnp.dot(k * k, bd, preferred_element_type=jnp.float32), 1e-24))

    d = qn_ref.shape[-1]
    # head-major stores (cold path, once per token tile) so kernel 2's hot loop reads
    # clean per-head planes.  V stream emitted in bf16 (safe; halves HBM traffic).
    for h in range(NUM_HEADS):
        sl = slice(h * d, (h + 1) * d)
        qn_ref[h] = qn[:, sl]
        kn_ref[h] = kn[:, sl]
        vm_ref[h] = v[:, sl].astype(jnp.bfloat16)


def yoso_attn_ffn_kernel(x_ref, qn_ref, kn_ref, vm_ref, qm_ref,
                         wo_ref, bo_ref, g1_ref, be1_ref,
                         wi_ref, bi_ref, w2_ref, b2_ref, g2_ref, be2_ref,
                         out_ref, acc_ref):
    ki = pl.program_id(2)

    @pl.when(ki == 0)
    def _init():
        acc_ref[...] = jnp.zeros_like(acc_ref)

    # ---- hot loop: head-major expectation attention over this key tile ----
    for h in range(NUM_HEADS):
        q_h = qn_ref[h]                           # (tq, d) f32
        k_h = kn_ref[h]                           # (tk, d) f32
        v_h = vm_ref[h]                           # (tk, d) bf16, key-masked
        s = lax.dot_general(q_h, k_h, (((1,), (1,)), ((), ())),
                            preferred_element_type=jnp.float32)       # (tq, tk)
        e = _ipow(_expectation_base(s), HASH_CODE_LEN)                 # f32 (parity)
        acc_ref[h] = acc_ref[h] + jnp.dot(e.astype(jnp.bfloat16), v_h,
                                          preferred_element_type=jnp.float32)

    @pl.when(ki == pl.num_programs(2) - 1)
    def _finalize():
        x = x_ref[...]                            # (tq, D) residual input
        qm = qm_ref[...]                          # (tq, 1) query mask (0/1)
        # normalize each head plane, assemble the (tq, D) context once, mask once,
        # then a SINGLE full-K output projection (fills the MXU).
        ctx = jnp.concatenate([_l2norm(acc_ref[h]) for h in range(NUM_HEADS)],
                              axis=-1) * qm
        attn = jnp.dot(ctx.astype(jnp.bfloat16), wo_ref[...],
                       preferred_element_type=jnp.float32) + bo_ref[...]
        # YosoSelfOutput
        y1 = _layer_norm(attn + x, g1_ref[...], be1_ref[...])
        # YosoIntermediate + YosoOutput
        inter = _gelu(jnp.dot(y1.astype(jnp.bfloat16), wi_ref[...],
                              preferred_element_type=jnp.float32) + bi_ref[...])
        ffn = jnp.dot(inter.astype(jnp.bfloat16), w2_ref[...],
                      preferred_element_type=jnp.float32) + b2_ref[...]
        out_ref[...] = _layer_norm(ffn + y1, g2_ref[...], be2_ref[...])


# ----------------------------------- wrappers ---------------------------------------
def _pick_seq_tile(S, target):
    if S <= target:
        return S
    t = (target // 8) * 8
    while t >= 8:
        if S % t == 0:
            return t
        t -= 8
    return S


def yoso_layer_pallas(x, mask, p, *, q_tile=256, k_tile=1024):
    B, S, D = x.shape
    d = D // NUM_HEADS
    ts = _pick_seq_tile(S, q_tile)      # row tiles (QKV kernel + q tiles)
    tq = ts
    tk = _pick_seq_tile(S, k_tile)      # key tiles streamed in the attention kernel
    m = mask.reshape(B, S, 1)
    vmem_limit = _vmem_limit_bytes()

    # block-diagonal ones (D, D): column h*d+j receives head-h's sum of squares
    head_ids = jnp.arange(D, dtype=jnp.int32) // d
    blkdiag = (head_ids[:, None] == head_ids[None, :]).astype(jnp.float32)

    # bf16 weights for the MXU-heavy matmuls (f32 accumulation in-kernel)
    wo_bf = p["wo"].astype(jnp.bfloat16)
    wi_bf = p["wi"].astype(jnp.bfloat16)
    w2_bf = p["w2"].astype(jnp.bfloat16)

    # whole-array VMEM operands: single resident copy (no double-buffered pipeline)
    wspec = pl.BlockSpec(memory_space=pltpu.MemorySpace.VMEM)

    # ---- kernel 1: QKV projection + per-head normalize + key-mask V (head-major) ----
    row_spec = pl.BlockSpec((None, ts, D), lambda b, si: (b, si, 0))
    km_spec = pl.BlockSpec((None, ts, 1), lambda b, si: (b, si, 0))
    hm_spec = pl.BlockSpec((None, NUM_HEADS, ts, d), lambda b, si: (b, 0, si, 0))
    qn, kn, vm = pl.pallas_call(
        yoso_qkv_kernel,
        out_shape=(jax.ShapeDtypeStruct((B, NUM_HEADS, S, d), jnp.float32),
                   jax.ShapeDtypeStruct((B, NUM_HEADS, S, d), jnp.float32),
                   jax.ShapeDtypeStruct((B, NUM_HEADS, S, d), jnp.bfloat16)),
        grid=(B, S // ts),
        in_specs=[row_spec, km_spec] + [wspec] * 7,
        out_specs=(hm_spec, hm_spec, hm_spec),
        compiler_params=pltpu.CompilerParams(
            dimension_semantics=("parallel", "parallel"),
            vmem_limit_bytes=vmem_limit),
    )(x, m, p["wq"], p["bq"], p["wk"], p["bk"], p["wv"], p["bv"], blkdiag)

    # ---- kernel 2: expectation attention (streamed K/V tiles) + SelfOutput + FFN ----
    q_spec = pl.BlockSpec((None, tq, D), lambda b, qi, ki: (b, qi, 0))
    qn_spec = pl.BlockSpec((None, NUM_HEADS, tq, d), lambda b, qi, ki: (b, 0, qi, 0))
    kv_spec = pl.BlockSpec((None, NUM_HEADS, tk, d), lambda b, qi, ki: (b, 0, ki, 0))
    qm_spec = pl.BlockSpec((None, tq, 1), lambda b, qi, ki: (b, qi, 0))
    out_spec = pl.BlockSpec((None, tq, D), lambda b, qi, ki: (b, qi, 0))

    out = pl.pallas_call(
        yoso_attn_ffn_kernel,
        out_shape=jax.ShapeDtypeStruct((B, S, D), jnp.float32),
        grid=(B, S // tq, S // tk),
        in_specs=[q_spec, qn_spec, kv_spec, kv_spec, qm_spec] + [wspec] * 10,
        out_specs=out_spec,
        scratch_shapes=[pltpu.VMEM((NUM_HEADS, tq, d), jnp.float32)],
        compiler_params=pltpu.CompilerParams(
            dimension_semantics=("parallel", "parallel", "arbitrary"),
            vmem_limit_bytes=vmem_limit),
    )(x, qn, kn, vm, m,
      wo_bf, p["bo"], p["g1"], p["be1"],
      wi_bf, p["bi"], w2_bf, p["b2"], p["g2"], p["be2"])
    return out


def yoso_encoder_pallas(hidden_states, attention_mask, layer_params, *,
                        q_tile=256, k_tile=1024):
    """attention_mask: [B, S] extended-mask values (0.0 keep, -10000.0 masked)."""
    # matches: attention_mask = (1.0 + attention_mask / 10000.0).int()
    mask_f = jnp.trunc(1.0 + attention_mask / 10000.0).astype(jnp.float32)
    h = hidden_states
    for p in layer_params:
        h = yoso_layer_pallas(h, mask_f, p, q_tile=q_tile, k_tile=k_tile)
    return h


# ------------------------------ pure-JAX reference --------------------------------
def _l2norm_ref(x):
    n = jnp.sqrt(jnp.sum(x * x, axis=-1, keepdims=True))
    return x / jnp.maximum(n, 1e-12)


def _ref_layer(x, mask_f, p):
    B, S, D = x.shape
    d = D // NUM_HEADS
    q = x @ p["wq"] + p["bq"]
    k = x @ p["wk"] + p["bk"]
    v = x @ p["wv"] + p["bv"]

    def split(t):
        return t.reshape(B, S, NUM_HEADS, d).transpose(0, 2, 1, 3)

    q, k, v = split(q), split(k), split(v)
    qn, kn = _l2norm_ref(q), _l2norm_ref(k)
    scores = jnp.clip(jnp.einsum("bhqd,bhkd->bhqk", qn, kn), -1.0, 1.0)
    expct = (1.0 - jnp.arccos(scores) / math.pi) ** HASH_CODE_LEN
    expct = expct * mask_f[:, None, :, None] * mask_f[:, None, None, :]
    ctx = _l2norm_ref(jnp.einsum("bhqk,bhkd->bhqd", expct, v))
    ctx = ctx.transpose(0, 2, 1, 3).reshape(B, S, D)
    attn = ctx @ p["wo"] + p["bo"]
    y1 = _layer_norm(attn + x, p["g1"], p["be1"])
    inter = jax.nn.gelu(y1 @ p["wi"] + p["bi"], approximate=False)
    ffn = inter @ p["w2"] + p["b2"]
    return _layer_norm(ffn + y1, p["g2"], p["be2"])


def yoso_encoder_ref(hidden_states, attention_mask, layer_params):
    mask_f = jnp.trunc(1.0 + attention_mask / 10000.0).astype(jnp.float32)
    h = hidden_states
    for p in layer_params:
        h = _ref_layer(h, mask_f, p)
    return h


# ------------------------------------ params --------------------------------------
def init_layer_params(key, D, I):
    ks = jax.random.split(key, 12)
    s = 0.02

    def w(k, shape):
        return s * jax.random.normal(k, shape, jnp.float32)

    return dict(
        wq=w(ks[0], (D, D)), bq=w(ks[1], (1, D)),
        wk=w(ks[2], (D, D)), bk=w(ks[3], (1, D)),
        wv=w(ks[4], (D, D)), bv=w(ks[5], (1, D)),
        wo=w(ks[6], (D, D)), bo=w(ks[7], (1, D)),
        g1=1.0 + w(ks[8], (1, D)), be1=w(ks[9], (1, D)),
        wi=w(ks[10], (D, I)), bi=jnp.zeros((1, I), jnp.float32),
        w2=w(ks[11], (I, D)), b2=jnp.zeros((1, D), jnp.float32),
        g2=jnp.ones((1, D), jnp.float32), be2=jnp.zeros((1, D), jnp.float32),
    )


# TODO(synk): the YosoLSHCumulation / fast_hash CUDA path (use_expectation=False) and the
# optional depthwise Conv2d (conv_window != None) are not exercised by the default config
# and are not implemented here; dropout is a no-op in eval mode.

if __name__ == "__main__":
    B, S, D, I, LAYERS = 2, 32, 32, 64, 2  # batch, seq, hidden, intermediate, layers

    root = jax.random.PRNGKey(0)
    k_x, k_p = jax.random.split(root)
    hidden_states = jax.random.normal(k_x, (B, S, D), jnp.float32)

    # extended attention mask: 0.0 = keep, -10000.0 = masked (last 5 tokens of batch 1)
    attention_mask = jnp.zeros((B, S), jnp.float32)
    attention_mask = attention_mask.at[1, S - 5:].set(-10000.0)

    layer_keys = jax.random.split(k_p, LAYERS)
    layer_params = [init_layer_params(k, D, I) for k in layer_keys]

    # small tiles so the (batch, q-tile, k-tile) accumulation pipeline is exercised
    out = yoso_encoder_pallas(hidden_states, attention_mask, layer_params,
                              q_tile=16, k_tile=16)
    out = jax.block_until_ready(out)

    ref = jax.block_until_ready(yoso_encoder_ref(hidden_states, attention_mask, layer_params))
    # bf16 operands on the "safe" matmuls (V stream, expct@V, wo, wi, w2) vs f32 ref
    np.testing.assert_allclose(np.asarray(out), np.asarray(ref), rtol=2e-3, atol=2e-3)

    print("KERNEL_OK")
</pallas_src>

<mosaic_0001>
module attributes {stable_mosaic.version = 11 : i64} {
  func.func @yoso_qkv_kernel(%arg0: i32, %arg1: i32, %arg2: memref<1x16x32xf32, #tpu.memory_space<vmem>>, %arg3: memref<1x16x1xf32, #tpu.memory_space<vmem>>, %arg4: memref<32x32xf32, #tpu.memory_space<vmem>>, %arg5: memref<1x32xf32, #tpu.memory_space<vmem>>, %arg6: memref<32x32xf32, #tpu.memory_space<vmem>>, %arg7: memref<1x32xf32, #tpu.memory_space<vmem>>, %arg8: memref<32x32xf32, #tpu.memory_space<vmem>>, %arg9: memref<1x32xf32, #tpu.memory_space<vmem>>, %arg10: memref<32x32xf32, #tpu.memory_space<vmem>>, %arg11: memref<1x2x16x16xf32, #tpu.memory_space<vmem>>, %arg12: memref<1x2x16x16xf32, #tpu.memory_space<vmem>>, %arg13: memref<1x2x16x16xbf16, #tpu.memory_space<vmem>>) attributes {dimension_semantics = [#tpu.dimension_semantics<parallel>, #tpu.dimension_semantics<parallel>], iteration_bounds = array<i64: 2, 2>, scalar_prefetch = 0 : i64, scratch_operands = 0 : i64, tpu.core_type = #tpu.core_type<tc>, window_params = [{transform_indices = @transform_0, window_bounds = array<i64: 1, 16, 32>}, {transform_indices = @transform_1, window_bounds = array<i64: 1, 16, 1>}, {pipeline_mode = #tpu.pipeline_mode<synchronous>, transform_indices = @transform_2, window_bounds = array<i64: 32, 32>}, {pipeline_mode = #tpu.pipeline_mode<synchronous>, transform_indices = @transform_3, window_bounds = array<i64: 1, 32>}, {pipeline_mode = #tpu.pipeline_mode<synchronous>, transform_indices = @transform_4, window_bounds = array<i64: 32, 32>}, {pipeline_mode = #tpu.pipeline_mode<synchronous>, transform_indices = @transform_5, window_bounds = array<i64: 1, 32>}, {pipeline_mode = #tpu.pipeline_mode<synchronous>, transform_indices = @transform_6, window_bounds = array<i64: 32, 32>}, {pipeline_mode = #tpu.pipeline_mode<synchronous>, transform_indices = @transform_7, window_bounds = array<i64: 1, 32>}, {pipeline_mode = #tpu.pipeline_mode<synchronous>, transform_indices = @transform_8, window_bounds = array<i64: 32, 32>}, {transform_indices = @transform_9, window_bounds = array<i64: 1, 2, 16, 16>}, {transform_indices = @transform_10, window_bounds = array<i64: 1, 2, 16, 16>}, {transform_indices = @transform_11, window_bounds = array<i64: 1, 2, 16, 16>}]} {
    %c0 = arith.constant 0 : index
    %c0_0 = arith.constant 0 : index
    %c0_1 = arith.constant 0 : index
    %0 = vector.load %arg2[%c0, %c0_0, %c0_1] : memref<1x16x32xf32, #tpu.memory_space<vmem>>, vector<1x16x32xf32>
    %1 = vector.shape_cast %0 : vector<1x16x32xf32> to vector<16x32xf32>
    %c0_2 = arith.constant 0 : index
    %c0_3 = arith.constant 0 : index
    %c0_4 = arith.constant 0 : index
    %2 = vector.load %arg3[%c0_2, %c0_3, %c0_4] : memref<1x16x1xf32, #tpu.memory_space<vmem>>, vector<1x16x1xf32>
    %3 = vector.shape_cast %2 : vector<1x16x1xf32> to vector<16x1xf32>
    %c0_5 = arith.constant 0 : index
    %c0_6 = arith.constant 0 : index
    %4 = vector.load %arg4[%c0_5, %c0_6] : memref<32x32xf32, #tpu.memory_space<vmem>>, vector<32x32xf32>
    %cst = arith.constant dense<0.000000e+00> : vector<16x32xf32>
    %5 = tpu.matmul %1, %4, %cst {dimension_numbers = #tpu.dot_dimension_numbers<[1], [0], [0], [1], [0, 0, 1, 1], [], []>} : vector<16x32xf32>, vector<32x32xf32>, vector<16x32xf32> -> vector<16x32xf32>
    %c0_7 = arith.constant 0 : index
    %c0_8 = arith.constant 0 : index
    %6 = vector.load %arg5[%c0_7, %c0_8] : memref<1x32xf32, #tpu.memory_space<vmem>>, vector<1x32xf32>
    %7 = vector.broadcast %6 : vector<1x32xf32> to vector<16x32xf32>
    %8 = arith.addf %5, %7 : vector<16x32xf32>
    %c0_9 = arith.constant 0 : index
    %c0_10 = arith.constant 0 : index
    %9 = vector.load %arg6[%c0_9, %c0_10] : memref<32x32xf32, #tpu.memory_space<vmem>>, vector<32x32xf32>
    %cst_11 = arith.constant dense<0.000000e+00> : vector<16x32xf32>
    %10 = tpu.matmul %1, %9, %cst_11 {dimension_numbers = #tpu.dot_dimension_numbers<[1], [0], [0], [1], [0, 0, 1, 1], [], []>} : vector<16x32xf32>, vector<32x32xf32>, vector<16x32xf32> -> vector<16x32xf32>
    %c0_12 = arith.constant 0 : index
    %c0_13 = arith.constant 0 : index
    %11 = vector.load %arg7[%c0_12, %c0_13] : memref<1x32xf32, #tpu.memory_space<vmem>>, vector<1x32xf32>
    %12 = vector.broadcast %11 : vector<1x32xf32> to vector<16x32xf32>
    %13 = arith.addf %10, %12 : vector<16x32xf32>
    %c0_14 = arith.constant 0 : index
    %c0_15 = arith.constant 0 : index
    %14 = vector.load %arg8[%c0_14, %c0_15] : memref<32x32xf32, #tpu.memory_space<vmem>>, vector<32x32xf32>
    %cst_16 = arith.constant dense<0.000000e+00> : vector<16x32xf32>
    %15 = tpu.matmul %1, %14, %cst_16 {dimension_numbers = #tpu.dot_dimension_numbers<[1], [0], [0], [1], [0, 0, 1, 1], [], []>} : vector<16x32xf32>, vector<32x32xf32>, vector<16x32xf32> -> vector<16x32xf32>
    %c0_17 = arith.constant 0 : index
    %c0_18 = arith.constant 0 : index
    %16 = vector.load %arg9[%c0_17, %c0_18] : memref<1x32xf32, #tpu.memory_space<vmem>>, vector<1x32xf32>
    %17 = vector.broadcast %16 : vector<1x32xf32> to vector<16x32xf32>
    %18 = arith.addf %15, %17 : vector<16x32xf32>
    %19 = vector.broadcast %3 : vector<16x1xf32> to vector<16x32xf32>
    %20 = arith.mulf %18, %19 : vector<16x32xf32>
    %c0_19 = arith.constant 0 : index
    %c0_20 = arith.constant 0 : index
    %21 = vector.load %arg10[%c0_19, %c0_20] : memref<32x32xf32, #tpu.memory_space<vmem>>, vector<32x32xf32>
    %22 = arith.mulf %8, %8 : vector<16x32xf32>
    %cst_21 = arith.constant dense<0.000000e+00> : vector<16x32xf32>
    %23 = tpu.matmul %22, %21, %cst_21 {dimension_numbers = #tpu.dot_dimension_numbers<[1], [0], [0], [1], [0, 0, 1, 1], [], []>} : vector<16x32xf32>, vector<32x32xf32>, vector<16x32xf32> -> vector<16x32xf32>
    %cst_22 = arith.constant 1.000000e-24 : f32
    %24 = vector.broadcast %cst_22 : f32 to vector<16x32xf32>
    %25 = arith.maximumf %23, %24 : vector<16x32xf32>
    %26 = math.rsqrt %25 : vector<16x32xf32>
    %27 = arith.mulf %8, %26 : vector<16x32xf32>
    %28 = arith.mulf %13, %13 : vector<16x32xf32>
    %cst_23 = arith.constant dense<0.000000e+00> : vector<16x32xf32>
    %29 = tpu.matmul %28, %21, %cst_23 {dimension_numbers = #tpu.dot_dimension_numbers<[1], [0], [0], [1], [0, 0, 1, 1], [], []>} : vector<16x32xf32>, vector<32x32xf32>, vector<16x32xf32> -> vector<16x32xf32>
    %cst_24 = arith.constant 1.000000e-24 : f32
    %30 = vector.broadcast %cst_24 : f32 to vector<16x32xf32>
    %31 = arith.maximumf %29, %30 : vector<16x32xf32>
    %32 = math.rsqrt %31 : vector<16x32xf32>
    %33 = arith.mulf %13, %32 : vector<16x32xf32>
    %34 = vector.extract_strided_slice %27 {offsets = [0, 0], sizes = [16, 16], strides = [1, 1]} : vector<16x32xf32> to vector<16x16xf32>
    %c0_25 = arith.constant 0 : index
    %c0_26 = arith.constant 0 : index
    %c0_27 = arith.constant 0 : index
    %c0_28 = arith.constant 0 : index
    %35 = vector.load %arg11[%c0_25, %c0_26, %c0_27, %c0_28] : memref<1x2x16x16xf32, #tpu.memory_space<vmem>>, vector<1x1x16x16xf32>
    %36 = vector.shape_cast %35 : vector<1x1x16x16xf32> to vector<16x16xf32>
    %37 = vector.shape_cast %34 : vector<16x16xf32> to vector<1x1x16x16xf32>
    tpu.vector_store %arg11[%c0_25, %c0_26, %c0_27, %c0_28], %37 {strides = array<i32>} : memref<1x2x16x16xf32, #tpu.memory_space<vmem>>, vector<1x1x16x16xf32>,
    %38 = vector.extract_strided_slice %33 {offsets = [0, 0], sizes = [16, 16], strides = [1, 1]} : vector<16x32xf32> to vector<16x16xf32>
    %c0_29 = arith.constant 0 : index
    %c0_30 = arith.constant 0 : index
    %c0_31 = arith.constant 0 : index
    %c0_32 = arith.constant 0 : index
    %39 = vector.load %arg12[%c0_29, %c0_30, %c0_31, %c0_32] : memref<1x2x16x16xf32, #tpu.memory_space<vmem>>, vector<1x1x16x16xf32>
    %40 = vector.shape_cast %39 : vector<1x1x16x16xf32> to vector<16x16xf32>
    %41 = vector.shape_cast %38 : vector<16x16xf32> to vector<1x1x16x16xf32>
    tpu.vector_store %arg12[%c0_29, %c0_30, %c0_31, %c0_32], %41 {strides = array<i32>} : memref<1x2x16x16xf32, #tpu.memory_space<vmem>>, vector<1x1x16x16xf32>,
    %42 = vector.extract_strided_slice %20 {offsets = [0, 0], sizes = [16, 16], strides = [1, 1]} : vector<16x32xf32> to vector<16x16xf32>
    %43 = arith.truncf %42 : vector<16x16xf32> to vector<16x16xbf16>
    %c0_33 = arith.constant 0 : index
    %c0_34 = arith.constant 0 : index
    %c0_35 = arith.constant 0 : index
    %c0_36 = arith.constant 0 : index
    %44 = vector.load %arg13[%c0_33, %c0_34, %c0_35, %c0_36] : memref<1x2x16x16xbf16, #tpu.memory_space<vmem>>, vector<1x1x16x16xbf16>
    %45 = vector.shape_cast %44 : vector<1x1x16x16xbf16> to vector<16x16xbf16>
    %46 = vector.shape_cast %43 : vector<16x16xbf16> to vector<1x1x16x16xbf16>
    tpu.vector_store %arg13[%c0_33, %c0_34, %c0_35, %c0_36], %46 {strides = array<i32>} : memref<1x2x16x16xbf16, #tpu.memory_space<vmem>>, vector<1x1x16x16xbf16>,
    %47 = vector.extract_strided_slice %27 {offsets = [0, 16], sizes = [16, 16], strides = [1, 1]} : vector<16x32xf32> to vector<16x16xf32>
    %c0_37 = arith.constant 0 : index
    %c1 = arith.constant 1 : index
    %c0_38 = arith.constant 0 : index
    %c0_39 = arith.constant 0 : index
    %48 = vector.load %arg11[%c0_37, %c1, %c0_38, %c0_39] : memref<1x2x16x16xf32, #tpu.memory_space<vmem>>, vector<1x1x16x16xf32>
    %49 = vector.shape_cast %48 : vector<1x1x16x16xf32> to vector<16x16xf32>
    %50 = vector.shape_cast %47 : vector<16x16xf32> to vector<1x1x16x16xf32>
    tpu.vector_store %arg11[%c0_37, %c1, %c0_38, %c0_39], %50 {strides = array<i32>} : memref<1x2x16x16xf32, #tpu.memory_space<vmem>>, vector<1x1x16x16xf32>,
    %51 = vector.extract_strided_slice %33 {offsets = [0, 16], sizes = [16, 16], strides = [1, 1]} : vector<16x32xf32> to vector<16x16xf32>
    %c0_40 = arith.constant 0 : index
    %c1_41 = arith.constant 1 : index
    %c0_42 = arith.constant 0 : index
    %c0_43 = arith.constant 0 : index
    %52 = vector.load %arg12[%c0_40, %c1_41, %c0_42, %c0_43] : memref<1x2x16x16xf32, #tpu.memory_space<vmem>>, vector<1x1x16x16xf32>
    %53 = vector.shape_cast %52 : vector<1x1x16x16xf32> to vector<16x16xf32>
    %54 = vector.shape_cast %51 : vector<16x16xf32> to vector<1x1x16x16xf32>
    tpu.vector_store %arg12[%c0_40, %c1_41, %c0_42, %c0_43], %54 {strides = array<i32>} : memref<1x2x16x16xf32, #tpu.memory_space<vmem>>, vector<1x1x16x16xf32>,
    %55 = vector.extract_strided_slice %20 {offsets = [0, 16], sizes = [16, 16], strides = [1, 1]} : vector<16x32xf32> to vector<16x16xf32>
    %56 = arith.truncf %55 : vector<16x16xf32> to vector<16x16xbf16>
    %c0_44 = arith.constant 0 : index
    %c1_45 = arith.constant 1 : index
    %c0_46 = arith.constant 0 : index
    %c0_47 = arith.constant 0 : index
    %57 = vector.load %arg13[%c0_44, %c1_45, %c0_46, %c0_47] : memref<1x2x16x16xbf16, #tpu.memory_space<vmem>>, vector<1x1x16x16xbf16>
    %58 = vector.shape_cast %57 : vector<1x1x16x16xbf16> to vector<16x16xbf16>
    %59 = vector.shape_cast %56 : vector<16x16xbf16> to vector<1x1x16x16xbf16>
    tpu.vector_store %arg13[%c0_44, %c1_45, %c0_46, %c0_47], %59 {strides = array<i32>} : memref<1x2x16x16xbf16, #tpu.memory_space<vmem>>, vector<1x1x16x16xbf16>,
    return
  }
  func.func @transform_0(%arg0: i32, %arg1: i32) -> (i32, i32, i32) {
    %c0_i32 = arith.constant 0 : i32
    %c0_i32_0 = arith.constant 0 : i32
    return %arg0, %arg1, %c0_i32 : i32, i32, i32
  }
  func.func @transform_1(%arg0: i32, %arg1: i32) -> (i32, i32, i32) {
    %c0_i32 = arith.constant 0 : i32
    %c0_i32_0 = arith.constant 0 : i32
    return %arg0, %arg1, %c0_i32 : i32, i32, i32
  }
  func.func @transform_2(%arg0: i32, %arg1: i32) -> (i32, i32) {
    %c0_i32 = arith.constant 0 : i32
    %c0_i32_0 = arith.constant 0 : i32
    %c0_i32_1 = arith.constant 0 : i32
    return %c0_i32, %c0_i32_0 : i32, i32
  }
  func.func @transform_3(%arg0: i32, %arg1: i32) -> (i32, i32) {
    %c0_i32 = arith.constant 0 : i32
    %c0_i32_0 = arith.constant 0 : i32
    %c0_i32_1 = arith.constant 0 : i32
    return %c0_i32, %c0_i32_0 : i32, i32
  }
  func.func @transform_4(%arg0: i32, %arg1: i32) -> (i32, i32) {
    %c0_i32 = arith.constant 0 : i32
    %c0_i32_0 = arith.constant 0 : i32
    %c0_i32_1 = arith.constant 0 : i32
    return %c0_i32, %c0_i32_0 : i32, i32
  }
  func.func @transform_5(%arg0: i32, %arg1: i32) -> (i32, i32) {
    %c0_i32 = arith.constant 0 : i32
    %c0_i32_0 = arith.constant 0 : i32
    %c0_i32_1 = arith.constant 0 : i32
    return %c0_i32, %c0_i32_0 : i32, i32
  }
  func.func @transform_6(%arg0: i32, %arg1: i32) -> (i32, i32) {
    %c0_i32 = arith.constant 0 : i32
    %c0_i32_0 = arith.constant 0 : i32
    %c0_i32_1 = arith.constant 0 : i32
    return %c0_i32, %c0_i32_0 : i32, i32
  }
  func.func @transform_7(%arg0: i32, %arg1: i32) -> (i32, i32) {
    %c0_i32 = arith.constant 0 : i32
    %c0_i32_0 = arith.constant 0 : i32
    %c0_i32_1 = arith.constant 0 : i32
    return %c0_i32, %c0_i32_0 : i32, i32
  }
  func.func @transform_8(%arg0: i32, %arg1: i32) -> (i32, i32) {
    %c0_i32 = arith.constant 0 : i32
    %c0_i32_0 = arith.constant 0 : i32
    %c0_i32_1 = arith.constant 0 : i32
    return %c0_i32, %c0_i32_0 : i32, i32
  }
  func.func @transform_9(%arg0: i32, %arg1: i32) -> (i32, i32, i32, i32) {
    %c0_i32 = arith.constant 0 : i32
    %c0_i32_0 = arith.constant 0 : i32
    %c0_i32_1 = arith.constant 0 : i32
    return %arg0, %c0_i32, %arg1, %c0_i32_0 : i32, i32, i32, i32
  }
  func.func @transform_10(%arg0: i32, %arg1: i32) -> (i32, i32, i32, i32) {
    %c0_i32 = arith.constant 0 : i32
    %c0_i32_0 = arith.constant 0 : i32
    %c0_i32_1 = arith.constant 0 : i32
    return %arg0, %c0_i32, %arg1, %c0_i32_0 : i32, i32, i32, i32
  }
  func.func @transform_11(%arg0: i32, %arg1: i32) -> (i32, i32, i32, i32) {
    %c0_i32 = arith.constant 0 : i32
    %c0_i32_0 = arith.constant 0 : i32
    %c0_i32_1 = arith.constant 0 : i32
    return %arg0, %c0_i32, %arg1, %c0_i32_0 : i32, i32, i32, i32
  }
}

</mosaic_0001>

<bundles_post_ra>
// kernel: tpu_custom_call.1
= control target key start
LH: loop header
LB: loop body
LE: loop exit
PB: predicated region body
PF: predicated region fallthrough
CT: control target
= control target key end

     0   :  { %17 = vsyncpa [#allocation3], 0  ;;  %s2148_s0 = inlined_call_operand.vmem [shape: f32[2,32,32], index: 0, kind: input, shape index: {}]   ;;  %s2149_s1 = inlined_call_operand.vmem [shape: f32[2,32,1], index: 1, kind: input, shape index: {}]   ;;  %s2150_s2 = inlined_call_operand.hbm [shape: f32[32,32], index: 2, kind: input, shape index: {}]   ;;  %s2151_s3 = inlined_call_operand.vmem [shape: f32[1,32], index: 3, kind: input, shape index: {}]   ;;  %s2152_s4 = inlined_call_operand.hbm [shape: f32[32,32], index: 4, kind: input, shape index: {}]   ;;  %s2153_s5 = inlined_call_operand.vmem [shape: f32[1,32], index: 5, kind: input, shape index: {}]   ;;  %s2154_s6 = inlined_call_operand.hbm [shape: f32[32,32], index: 6, kind: input, shape index: {}]   ;;  %s2155_s7 = inlined_call_operand.vmem [shape: f32[1,32], index: 7, kind: input, shape index: {}]   ;;  %s2156_s8 = inlined_call_operand.hbm [shape: f32[32,32], index: 8, kind: input, shape index: {}]   ;;  %s2157_s9 = inlined_call_operand.vmem [shape: f32[2,2,32,16], index: 9, kind: output, shape index: {0}]   ;;  %s2158_s10 = inlined_call_operand.vmem [shape: f32[2,2,32,16], index: 10, kind: output, shape index: {1}]   ;;  %s2159_s11 = inlined_call_operand.vmem [shape: bf16[2,2,32,16], index: 11, kind: output, shape index: {2}]  }
   0x1   :  { %18 = vsyncpa [#allocation5], 0 }
   0x2   :  { %19 = vsyncpa [#allocation8], 0  ;;  %s1901_s17 = smov 0   ;;  %s1903_s18 = smov 0  }
   0x3   :  { %s1905_s19 = smov 0   ;;  %s1907_s20 = smov 0  }
   0x4   :  { %s1909_s21 = smov 0   ;;  %s1911_s22 = smov 0  }
   0x5   :  { %s1913_s23 = smov 0  }
   0x6 LB: > { %2164 = sst [smem:[#allocation15_spill]] %s1823_s21  ;;  %s1407_s24 = sadd.s32 4294967295, %s1831_s23   ;;  %s1831_s23 = sphi %s1913_s23, %s25_s23   ;;  %s1827_s22 = sphi %s1911_s22, %s2177_s22   ;;  %s1823_s21 = sphi %s1909_s21, %s2176_s21   ;;  %s1819_s20 = sphi %s1907_s20, %s2175_s20   ;;  %s1815_s19 = sphi %s1905_s19, %s2174_s19   ;;  %s1811_s18 = sphi %s1903_s18, %s2179_s18   ;;  %s1807_s17 = sphi %s1901_s17, %s2178_s17  }
   0x7   : > { %2165 = sst [smem:[#allocation16_spill]] %s1827_s22  ;;  %s34_s25 = sadd.s32 1, %s1823_s21 }
   0x8   : > { %p35_p0 = scmp.ge.s32.totalorder %s34_s25, 2  ;;  %s37_s26 = sadd.s32 1, %s1827_s22 }
   0x9   : > { %s249_s27 = sadd.s32 1, %s1811_s18  ;;  %p259_p1 = scmp.ne.s32.totalorder %s1811_s18, %s1807_s17 }
   0xa   : > { %s2181_s25 = smov (%p35_p0, %s34_s25), 0  ;;  %s2183_s26 = smov (!%p35_p0, %s37_s26), %s1827_s22 }
   0xb   : > { %2166 = sst [smem:[#allocation17_spill]] %s2181_s25  ;;  %s245_s28 = ssub.s32 %s1823_s21, %s2181_s25 }
   0xc   : > { %p260_p2 = scmp.eq.s32.totalorder %s1407_s24, 3  ;;  %p39_p3 = scmp.ge.s32.totalorder %s2183_s26, 2 }
   0xd   : > { %p1409_p4 = scmp.ge.s32.totalorder %s1831_s23, 1  ;;  %p329_p6 = scmp.lt.s32.totalorder %s1831_s23, 5 }
   0xe   : > { %p1948_p5 = por %p260_p2, %p259_p1  ;;  %s2185_s26 = smov (%p39_p3, %s2183_s26), 0 }
   0xf   : > { %2168 = sst [smem:[#allocation18_spill]] %s2185_s26  ;;  %p1955_p7 = pnand %p1409_p4, %p329_p6 }
  0x10   : > { %s244_s12 = ssub.s32 %s1827_s22, %s2185_s26  ;;  %p1961_p8 = scmp.eq.s32.totalorder %s1407_s24, 0 }
  0x11   : > { %s246_s14 = sor.u32 %s245_s28, %s244_s12  ;;  %p1567_p9 = pneg %p1955_p7 }
  0x12   : > { %p247_p10 = scmp.eq.s32.totalorder %s246_s14, 0  ;;  %s1833_s25 = smov [#allocation4]  }
  0x13   : > { %p1969_p11 = pnand %p1961_p8, %p1567_p9  ;;  %s357_s26 = sshll.u32 %s1833_s25, 4  ;;  %s358_s26 = int_to_ptr.vmem [resolvable:$true] %s357_s26 }
  0x14   : > { %s1974_s16 = scalar_select %p247_p10, %s1811_s18, %s249_s27  }
  0x15   : > { %p1663_p12 = pneg %p1969_p11  ;;  %s1672_s24 = scalar_lea.vmem %s358_s26, 512 }
  0x16   : > { %2172 = sst [smem:[#allocation19_spill]] %s1974_s16  ;;  %p1673_p13 = scmp.ne.s32.totalorder %s358_s26, %s1672_s24 }
  0x17   : > { %p1680_p2 = scmp.lt.s32.totalorder %s358_s26, %s358_s26  ;;  %p1681_p3 = scmp.lt.s32.totalorder %s1672_s24, %s1672_s24 }
  0x18   : > { %p1675_p0 = pnand %p1673_p13, %p1663_p12 }
  0x19   : > { %p1682_p4 = por %p1681_p3, %p1680_p2 }
  0x1a   : > { %p1676_p1 = pneg %p1675_p0 }
  0x1c   : > { %p1683_p6 = pnand %p1682_p4, %p1676_p1 }
  0x1e   : > { %1686 = shalt.err (!%p1683_p6)
}
  0x1f   : > { %s1834_s28 = smov 128   ;;  %s1835_s27 = smov 8  }
  0x20   : > { %1573 = dma.hbm_to_vmem [thread:$0]  (!%p1969_p11), %s2152_s4, 512, %s358_s26, [#allocation5], %s1834_s28, %s1834_s28, %s1835_s27  }
  0x21   : > { %s1836_s14 = smov [#allocation2]   ;;  %s1837_s21 = smov [#allocation6]  }
  0x22   : > { %s341_s22 = sshll.u32 %s1836_s14, 4  ;;  %s373_s16 = sshll.u32 %s1837_s21, 4  ;;  %s342_s22 = int_to_ptr.vmem [resolvable:$true] %s341_s22  ;;  %s374_s16 = int_to_ptr.vmem [resolvable:$true] %s373_s16 }
  0x23   : > { %s1698_s24 = scalar_lea.vmem %s342_s22, 512  ;;  %p1706_p0 = scmp.lt.s32.totalorder %s342_s22, %s342_s22 }
  0x24   : > { %p1699_p9 = scmp.ne.s32.totalorder %s342_s22, %s1698_s24  ;;  %p1707_p1 = scmp.lt.s32.totalorder %s1698_s24, %s1698_s24 }
  0x26   : > { %p1701_p10 = pnand %p1699_p9, %p1663_p12  ;;  %p1708_p2 = por %p1707_p1, %p1706_p0 }
  0x28   : > { %p1702_p13 = pneg %p1701_p10 }
  0x2a   : > { %p1709_p3 = pnand %p1708_p2, %p1702_p13 }
  0x2c   : > { %1712 = shalt.err (!%p1709_p3)
}
  0x2d   : > { %1570 = dma.hbm_to_vmem [thread:$0]  (!%p1969_p11), %s2150_s2, 512, %s342_s22, [#allocation3], %s1834_s28, %s1834_s28, %s1835_s27  }
  0x2e   : > { %s1724_s25 = scalar_lea.vmem %s374_s16, 512  ;;  %p1732_p10 = scmp.lt.s32.totalorder %s374_s16, %s374_s16 }
  0x2f   : > { %p1725_p4 = scmp.ne.s32.totalorder %s374_s16, %s1724_s25  ;;  %p1733_p0 = scmp.lt.s32.totalorder %s1724_s25, %s1724_s25 }
  0x31   : > { %p1727_p6 = pnand %p1725_p4, %p1663_p12  ;;  %p1734_p13 = por %p1733_p0, %p1732_p10 }
  0x33   : > { %p1728_p9 = pneg %p1727_p6 }
  0x35   : > { %p1735_p1 = pnand %p1734_p13, %p1728_p9 }
  0x37   : > { %1738 = shalt.err (!%p1735_p1)
}
  0x38   : > { %1576 = dma.hbm_to_vmem [thread:$0]  (!%p1969_p11), %s2154_s6, 512, %s374_s16, [#allocation5], %s1834_s28, %s1834_s28, %s1835_s27  }
  0x39   : > { %s1838_s22 = smov [#allocation7]  }
  0x3a   : > { %s389_s24 = sshll.u32 %s1838_s22, 4  ;;  %s390_s24 = int_to_ptr.vmem [resolvable:$true] %s389_s24 }
  0x3b   : > { %s1750_s26 = scalar_lea.vmem %s390_s24, 512  ;;  %p1758_p6 = scmp.lt.s32.totalorder %s390_s24, %s390_s24 }
  0x3c   : > { %p1751_p2 = scmp.ne.s32.totalorder %s390_s24, %s1750_s26  ;;  %p1759_p9 = scmp.lt.s32.totalorder %s1750_s26, %s1750_s26 }
  0x3e   : > { %p1753_p3 = pnand %p1751_p2, %p1663_p12  ;;  %p1760_p10 = por %p1759_p9, %p1758_p6 }
  0x40   : > { %p1754_p4 = pneg %p1753_p3 }
  0x42   : > { %p1761_p0 = pnand %p1760_p10, %p1754_p4 }
  0x44   : > { %1764 = shalt.err (!%p1761_p0)
}
  0x45   : > { %1579 = dma.hbm_to_vmem [thread:$0]  (!%p1969_p11), %s2156_s8, 512, %s390_s24, [#allocation8], %s1834_s28, %s1834_s28, %s1835_s27  }
  0x46   : > { %431 = sbr.rel (%p1955_p7) target bundleno = 644 (0x284), region = 56 }
  0x4b   : > { %1794 = dma.done.wait (%p1961_p8), [#allocation3], 512  }
  0x4c   : > { %1796 = vsyncadd (%p1961_p8), [#allocation3], 4294966784 }
  0x4d   : > { %1798 = dma.done.wait (%p1961_p8), [#allocation5], 1024  }
  0x4e   : > { %1800 = vsyncadd (%p1961_p8), [#allocation5], 4294966272 }
  0x4f   : > { %1802 = dma.done.wait (%p1961_p8), [#allocation8], 512  }
  0x50   : > { %1804 = vsyncadd (%p1961_p8), [#allocation8], 4294966784  ;;  %s2037_s30 = sshll.u32 %s1815_s19, 1  ;;  %p504_p7 = scmp.lt.s32.totalorder %s1819_s20, 1  ;;  %v533_v0 = vld [vmem:[#allocation2 + $0x18] sm:$0xff]  ;;  %v532_v2 = vld [vmem:[#allocation2 + $0x10] sm:$0xff] }
  0x51   : > { %p506_p11 = scmp.lt.s32.totalorder %s2037_s30, 3  ;;  %v626_v1 = vld [vmem:[#allocation4 + $0x18] sm:$0xff]  ;;  %1496 = vmatprep.subr.mxu0 %v533_v0  ;;  %v625_v3 = vld [vmem:[#allocation4 + $0x10] sm:$0xff]  ;;  %v531_v4 = vld [vmem:[#allocation2 + $0x8] sm:$0xff]  ;;  %vm541_vm0 = vcmask 261120   ;;  %v1839_v18 = vmov 0  }
  0x52   : > { %s505_s15 = scalar_select %p504_p7, %s1819_s20, 1  ;;  %1507 = vmatprep.subr.mxu1 %v626_v1  ;;  %1497 = vmatpush3.msra.mxu0 %v533_v0  ;;  %v624_v5 = vld [vmem:[#allocation4 + $0x8] sm:$0xff]  ;;  %v530_v6 = vld [vmem:[#allocation2] sm:$0xff]  ;;  %v712_v10 = vld [vmem:[#allocation6 + $0x18] sm:$0xff]  ;;  %vm1002_vm1 = vcmask 125952   ;;  %vm989_vm2 = vcmask 130048  }
  0x53   : > { %s507_s28 = scalar_select %p506_p11, %s2037_s30, 3  ;;  %1508 = vmatpush3.msra.mxu1 %v626_v1  ;;  %1498 = vmatprep.subr.mxu0 %v532_v2  ;;  %v623_v7 = vld [vmem:[#allocation4] sm:$0xff]  ;;  %v711_v11 = vld [vmem:[#allocation6 + $0x10] sm:$0xff]  ;;  %v710_v12 = vld [vmem:[#allocation6 + $0x8] sm:$0xff] }
  0x54   : > { %s1424_s27 = sshll.u32 %s505_s15, 2  ;;  %1509 = vmatprep.subr.mxu1 %v625_v3  ;;  %1499 = vmatpush3.msra.mxu0 %v532_v2  ;;  %v709_v13 = vld [vmem:[#allocation6] sm:$0xff]  ;;  %v810_v14 = vld [vmem:[#allocation7 + $0x18] sm:$0xff]  ;;  %v809_v15 = vld [vmem:[#allocation7 + $0x10] sm:$0xff] }
  0x55   : > { %s2043_s25 = sadd.s32 %s1424_s27, %s507_s28  ;;  %1510 = vmatpush3.msra.mxu1 %v625_v3  ;;  %1500 = vmatprep.subr.mxu0 %v531_v4  ;;  %v808_v16 = vld [vmem:[#allocation7 + $0x8] sm:$0xff]  ;;  %v807_v17 = vld [vmem:[#allocation7] sm:$0xff] }
  0x56   : > { %s1425_s12 = sshll.u32 %s2043_s25, 3  ;;  %1511 = vmatprep.subr.mxu1 %v624_v5  ;;  %1501 = vmatpush3.msra.mxu0 %v531_v4  ;;  %v1432_v21 = vld [vmem:[%s2153_s5] ss:$0 sm:$0xff] }
  0x57   : > { %s511_s14 = scalar_lea.vmem %s2148_s0, %s1425_s12  ;;  %1512 = vmatpush3.msra.mxu1 %v624_v5  ;;  %1502 = vmatprep.subr.mxu0 %v530_v6  ;;  %s521_s26 = scalar_lea.vmem %s2149_s1, %s1425_s12  ;;  %v1429_v22 = vld [vmem:[%s2151_s3] ss:$0 sm:$0xff] }
  0x58   : > { %v526_v8 = vld [vmem:[%s511_s14] sm:$0xff]  ;;  %1513 = vmatprep.subr.mxu1 %v623_v7  ;;  %v527_v9 = vld [vmem:[%s511_s14 + $0x8] sm:$0xff]  ;;  %1503 = vmatpush3.msra.mxu0 %v530_v6  ;;  %s488_s12 = sand.u32 1, %s1807_s17   ;;  %s1840_s14 = smov 112  }
  0x59   : > { %1504 = vmatprep.mubr.msk.f32.mxu0 %vm541_vm0, %v526_v8  ;;  %1514 = vmatpush3.msra.mxu1 %v623_v7  ;;  %v528_v19 = vld [vmem:[%s521_s26] sm:$0xff]  ;;  %v529_v20 = vld [vmem:[%s521_s26 + $0x8] sm:$0xff]  ;;  %s1422_s19 = sshll.u32 %s488_s12, 4  ;;  %s1420_s17 = sshll.u32 %s488_s12, 5 }
  0x5a   : > { %1515 = vmatprep.mubr.msk.f32.mxu1 %vm541_vm0, %v526_v8  ;;  %1505 = vmatmul.mubr.msk.f32.vlgmr.msra.gmra.mxu0 %vm541_vm0, %v527_v9  ;;  %v1435_v37 = vld [vmem:[%s2155_s7] ss:$0 sm:$0xff]  ;;  %s2076_s13 = scalar_lea.vmem [#allocation11], %s1422_s19  ;;  %s490_s22 = scalar_lea.vmem [#allocation9], %s1420_s17 }
  0x5b   : > { %1516 = vmatmul.mubr.msk.f32.vlgmr.msra.gmra.mxu1 %vm541_vm0, %v527_v9  ;;  %1518 = vmatprep.subr.mxu0 %v712_v10  ;;  %s2083_s24 = scalar_lea.vmem [#allocation10], %s1420_s17  ;;  %s1454_s26 = sshll.u32 (%p1948_p5), %s1819_s20, 3 }
  0x5c   : > { %1526 = vmatprep.mubr.msk.f32.mxu0 %vm541_vm0, %v526_v8  ;;  %1519 = vmatpush3.msra.mxu0 %v712_v10  ;;  %s1053_s16 = sadd.s32 (%p1948_p5), %s1454_s26, %s2037_s30 }
  0x5d   : > { %1520 = vmatprep.subr.mxu0 %v711_v11  ;;  %1529 = vmatprep.subr.mxu1 %v810_v14  ;;  %s1455_s21 = sshll.u32 (%p1948_p5), %s1053_s16, 3 }
  0x5e   : > { %1521 = vmatpush3.msra.mxu0 %v711_v11  ;;  %1530 = vmatpush3.msra.mxu1 %v810_v14  ;;  %s1055_s27 = scalar_lea.vmem (%p1948_p5), %s2157_s9, %s1455_s21 }
  0x5f   : > { %1522 = vmatprep.subr.mxu0 %v710_v12  ;;  %1531 = vmatprep.subr.mxu1 %v809_v15 }
  0x60   : > { %1523 = vmatpush3.msra.mxu0 %v710_v12  ;;  %1532 = vmatpush3.msra.mxu1 %v809_v15 }
  0x61   : > { %1524 = vmatprep.subr.mxu0 %v709_v13  ;;  %1533 = vmatprep.subr.mxu1 %v808_v16 }
  0x62   : > { %1525 = vmatpush3.msra.mxu0 %v709_v13  ;;  %1534 = vmatpush3.msra.mxu1 %v808_v16 }
  0x63   : > { %1527 = vmatmul.mubr.msk.f32.vlgmr.msra.gmra.mxu0 %vm541_vm0, %v527_v9  ;;  %1540 = vmatprep.subr.mxu0 %v810_v14 }
  0x64   : > { %1541 = vmatpush3.msra.mxu0 %v810_v14  ;;  %1535 = vmatprep.subr.mxu1 %v807_v17 }
  0x65   : > { %1542 = vmatprep.subr.mxu0 %v809_v15  ;;  %1536 = vmatpush3.msra.mxu1 %v807_v17 }
  0x66   : > { %1543 = vmatpush3.msra.mxu0 %v809_v15  ;;  %1652 = vset.pattern.permute.xlu0 %v1839_v18 }
  0x67   : > { %1544 = vmatprep.subr.mxu0 %v808_v16  ;;  %797 = vperm.xlu0 %1652, %v528_v19  }
  0x68   : > { %1545 = vmatpush3.msra.mxu0 %v808_v16 }
  0x69   : > { %1546 = vmatprep.subr.mxu0 %v807_v17 }
  0x6a   : > { %1547 = vmatpush3.msra.mxu0 %v807_v17 }
  0x6b   : > { %802 = vperm.xlu0 %1652, %v529_v20  }
  0xe2   : > { %v798_v36 = vpop.permute.xlu0 %797 }
  0xe6   : > { %v803_v41 = vpop.permute.xlu0 %802 }
 0x11a   : > { %v1506_v23 = vpop.f32.mrf.mxu0 }
 0x11b   : > { %v1517_v24 = vpop.f32.mrf.mxu1  ;;  %v620_v26 = vadd.f32 %v1506_v23, %v1429_v22 }
 0x11c   : > { %v706_v25 = vadd.f32 %v1517_v24, %v1432_v21  ;;  %v614_v27 = vpop.f32.mrf.mxu0 }
 0x11d   : > { %v700_v28 = vpop.f32.mrf.mxu1  ;;  %v615_v29 = vadd.f32 %v1429_v22, %v614_v27  ;;  %v812_v34 = vmul.f32 %v620_v26, %v620_v26 }
 0x11e   : > { %v701_v30 = vadd.f32 %v1432_v21, %v700_v28  ;;  %v901_v31 = vmul.f32 %v706_v25, %v706_v25 }
 0x11f   : > { %v811_v32 = vmul.f32 %v615_v29, %v615_v29 }
 0x120   : > { %v900_v33 = vmul.f32 %v701_v30, %v701_v30 }
 0x121   : > { %1537 = vmatprep.mubr.msk.f32.mxu1 %vm541_vm0, %v811_v32 }
 0x122   : > { %1548 = vmatprep.mubr.msk.f32.mxu0 %vm541_vm0, %v900_v33  ;;  %1538 = vmatmul.mubr.msk.f32.vlgmr.msra.gmra.mxu1 %vm541_vm0, %v812_v34 }
 0x123   : > { %1549 = vmatmul.mubr.msk.f32.vlgmr.msra.gmra.mxu0 %vm541_vm0, %v901_v31  ;;  %v1528_v35 = vpop.f32.mrf.mxu0 }
 0x124   : > { %v792_v39 = vadd.f32 %v1528_v35, %v1435_v37 }
 0x125   : > { %v786_v38 = vpop.f32.mrf.mxu0 }
 0x126   : > { %v787_v40 = vadd.f32 %v1435_v37, %v786_v38  ;;  %v806_v43 = vmul.f32 %v803_v41, %v792_v39 }
 0x128   : > { %v805_v42 = vmul.f32 %v798_v36, %v787_v40  ;;  %v1465_v45 = vpack.c.bf16 %v806_v43, %v806_v43 }
 0x12a   : > { %v1464_v44 = vpack.c.bf16 %v805_v42, %v805_v42  ;;  %1004 = vst.msk [vmem:[%s2076_s13 + $0x4] sm:$0xf] %vm1002_vm1, %v1465_v45 }
 0x12c   : > { %1003 = vst.msk [vmem:[%s2076_s13] sm:$0xf] %vm1002_vm1, %v1464_v44 }
 0x1e2   : > { %v1539_v46 = vpop.f32.mrf.mxu1 }
 0x1e3   : > { %v1550_v47 = vpop.f32.mrf.mxu0  ;;  %v895_v48 = vmax.f32 %v1539_v46, 1e-24 }
 0x1e4   : > { %v984_v49 = vmax.f32 %v1550_v47, 1e-24  ;;  %v885_v50 = vpop.f32.mrf.mxu1 }
 0x1e5   : > { %v974_v51 = vpop.f32.mrf.mxu0  ;;  %1653 = vrsqrt.f32 %v895_v48  ;;  %v894_v52 = vmax.f32 %v885_v50, 1e-24 }
 0x1e6   : > { %v983_v53 = vmax.f32 %v974_v51, 1e-24  ;;  %1655 = vrsqrt.f32 %v984_v49 }
 0x1e7   : > { %1657 = vrsqrt.f32 %v894_v52 }
 0x1e8   : > { %1659 = vrsqrt.f32 %v983_v53 }
 0x1f2   : > { %v1654_v54 = vpop.eup %1653 }
 0x1f3   : > { %v1656_v55 = vpop.eup %1655  ;;  %v899_v56 = vmul.f32 %v1654_v54, %v620_v26 }
 0x1f4   : > { %v1658_v57 = vpop.eup %1657  ;;  %v988_v58 = vmul.f32 %v1656_v55, %v706_v25 }
 0x1f5   : > { %v1660_v59 = vpop.eup %1659  ;;  %1009 = vrot.lane.b32.xlu1 %v899_v56, %s1840_s14  ;;  %v898_v60 = vmul.f32 %v1658_v57, %v615_v29  ;;  %991 = vst.msk [vmem:[%s490_s22 + $0x8] sm:$0xff] %vm989_vm2, %v899_v56 }
 0x1f6   : > { %v987_v61 = vmul.f32 %v1660_v59, %v701_v30  ;;  %993 = vst.msk [vmem:[%s2083_s24 + $0x8] sm:$0xff] %vm989_vm2, %v988_v58 }
 0x1f7   : > { %990 = vst.msk [vmem:[%s490_s22] sm:$0xff] %vm989_vm2, %v898_v60 }
 0x1f8   : > { %1018 = vrot.lane.b32.xlu0 %v987_v61, %s1840_s14  ;;  %992 = vst.msk [vmem:[%s2083_s24] sm:$0xff] %vm989_vm2, %v987_v61 }
 0x1f9   : > { %1020 = vrot.lane.b32.xlu1 %v988_v58, %s1840_s14 }
 0x1fc   : > { %1027 = vrot.lane.b32.xlu0 %v1464_v44, %s1840_s14  ;;  %v1092_v5 = vld [vmem:[%s490_s22 + $0x8] sm:$0xff] (%p1948_p5) }
 0x1fd   : > { %1007 = vrot.lane.b32.xlu1 %v898_v60, %s1840_s14  ;;  %1093 = vst [vmem:[%s1055_s27 + $0x8] sm:$0xff] (%p1948_p5), %v1092_v5 }
 0x1fe   : > { %v1090_v4 = vld [vmem:[%s490_s22] sm:$0xff] (%p1948_p5) }
 0x1ff   : > { %1091 = vst [vmem:[%s1055_s27] sm:$0xff] (%p1948_p5), %v1090_v4 }
 0x201   : > { %1029 = vrot.lane.b32.xlu1 %v1465_v45, %s1840_s14 }
 0x267   : > { %v1010_v62 = vpop.permute.xlu1 %1009 }
 0x268   : > { %1445 = vst.msk [vmem:[%s490_s22 + $0x18] sm:$0xff] %vm989_vm2, %v1010_v62 }
 0x26a   : > { %v1019_v63 = vpop.permute.xlu0 %1018 }
 0x26b   : > { %1446 = vst.msk [vmem:[%s2083_s24 + $0x10] sm:$0xff] %vm989_vm2, %v1019_v63  ;;  %v1021_v0 = vpop.permute.xlu1 %1020 }
 0x26c   : > { %1447 = vst.msk [vmem:[%s2083_s24 + $0x18] sm:$0xff] %vm989_vm2, %v1021_v0 }
 0x26e   : > { %v1028_v1 = vpop.permute.xlu0 %1027 }
 0x26f   : > { %1448 = vst.msk [vmem:[%s2076_s13 + $0x8] sm:$0xf] %vm1002_vm1, %v1028_v1  ;;  %v1008_v2 = vpop.permute.xlu1 %1007  ;;  %v1096_v7 = vld [vmem:[%s490_s22 + $0x18] sm:$0xff] (%p1948_p5) }
 0x270   : > { %1444 = vst.msk [vmem:[%s490_s22 + $0x10] sm:$0xff] %vm989_vm2, %v1008_v2  ;;  %1050 = sbr.rel (!%p1948_p5) target bundleno = 633 (0x279), region = 76  ;;  %1097 = vst [vmem:[%s1055_s27 + $0x28] sm:$0xff] (%p1948_p5), %v1096_v7 }
 0x273   : > { %v1030_v3 = vpop.permute.xlu1 %1029 }
 0x274   : > { %1449 = vst.msk [vmem:[%s2076_s13 + $0xc] sm:$0xf] %vm1002_vm1, %v1030_v3 }
 0x277   : > { %v1094_v6 = vld [vmem:[%s490_s22 + $0x10] sm:$0xff] }
 0x278   : > { %1095 = vst [vmem:[%s1055_s27 + $0x20] sm:$0xff] %v1094_v6 }
 0x279 PF: > { %1103 = sbr.rel (!%p1948_p5) target bundleno = 639 (0x27f), region = 114  ;;  %s1457_s25 = sshll.u32 (%p1948_p5), %s1819_s20, 3  ;;  %v1143_v8 = vld [vmem:[%s2083_s24] sm:$0xff] (%p1948_p5)  ;;  %v1145_v9 = vld [vmem:[%s2083_s24 + $0x8] sm:$0xff] (%p1948_p5)  ;;  %v1147_v10 = vld [vmem:[%s2083_s24 + $0x10] sm:$0xff] (%p1948_p5) }
 0x27a   : > { %s1106_s12 = sadd.s32 (%p1948_p5), %s1457_s25, %s2037_s30  ;;  %v1149_v11 = vld [vmem:[%s2083_s24 + $0x18] sm:$0xff] (%p1948_p5) }
 0x27b   : > { %s1458_s19 = sshll.u32 (%p1948_p5), %s1106_s12, 3 }
 0x27c   : > { %s1108_s22 = scalar_lea.vmem (%p1948_p5), %s2158_s10, %s1458_s19 }
 0x27d   : > { %1144 = vst [vmem:[%s1108_s22] sm:$0xff] (%p1948_p5), %v1143_v8  ;;  %1146 = vst [vmem:[%s1108_s22 + $0x8] sm:$0xff] (%p1948_p5), %v1145_v9 }
 0x27e   : > { %1148 = vst [vmem:[%s1108_s22 + $0x20] sm:$0xff] %v1147_v10  ;;  %1150 = vst [vmem:[%s1108_s22 + $0x28] sm:$0xff] %v1149_v11 }
 0x27f PF: > { %1156 = sbr.rel (!%p1948_p5) target bundleno = 644 (0x284), region = 152  ;;  %s1460_s26 = sshll.u32 (%p1948_p5), %s1819_s20, 3  ;;  %v1178_v12 = vld [vmem:[%s2076_s13] sm:$0xff] (%p1948_p5)  }
 0x280   : > { %s1159_s16 = sadd.s32 (%p1948_p5), %s1460_s26, %s2037_s30  ;;  %v1182_v13 = vld [vmem:[%s2076_s13 + $0x8] sm:$0xff] (%p1948_p5)  }
 0x281   : > { %s1461_s24 = sshll.u32 (%p1948_p5), %s1159_s16, 2 }
 0x282   : > { %s1161_s28 = scalar_lea.vmem (%p1948_p5), %s2159_s11, %s1461_s24 }
 0x283   : > { %1179 = vst [vmem:[%s1161_s28] sm:$0xff] (%p1948_p5), %v1178_v12   ;;  %1183 = vst [vmem:[%s1161_s28 + $0x10] sm:$0xff] (%p1948_p5), %v1182_v13  }
 0x284 PF: > { %s25_s23 = sadd.s32 1, %s1831_s23   ;;  %s2173_s29 = sld [smem:[#allocation19_spill]] }
 0x285   : > { %p22_p5 = scmp.ge.s32.totalorder %s25_s23, 6   ;;  %s2174_s19 = sld [smem:[#allocation15_spill]] }
 0x286   : > { %s2175_s20 = sld [smem:[#allocation16_spill]]  ;;  %s2178_s17 = smov %s1811_s18 }
 0x287   : > { %s2176_s21 = sld [smem:[#allocation17_spill]]  ;;  %24 = sbr.rel (!%p22_p5) target bundleno = 6 (0x6), region = 250 }
 0x288   : > { %s2177_s22 = sld [smem:[#allocation18_spill]] }
 0x28a   : > { %s2179_s18 = smov %s2173_s29 }
 0x28c   :  { %1241 = vsyncpa [#allocation3], 1 }
 0x28d   :  { %1243 = vsyncpa [#allocation3 + $0x1], 1 }
 0x28e   :  { %1244 = vsyncpa [#allocation5], 1 }
 0x28f   :  { %1245 = vsyncpa [#allocation8], 1 }

</bundles_post_ra>
